<compile_context>
chip_gen: v6e
topology: v6e:2x2x1
jax: 0.10.0
libtpu: 0.0.40
codegen_flags: <defaults>
</compile_context>

<pallas_src>
import jax
import jax.numpy as jnp
from jax.experimental import pallas as pl
from jax.experimental.pallas import tpu as pltpu


def _actor_critic_kernel(x_ref, w1_ref, b1_ref, w2_ref, b2_ref,
                         wh_ref, bh_ref, out_ref):
    """Fused forward: relu(x@W1+b1) -> relu(.@W2+b2) -> .@[Wpi|Wv|0pad] + bias.

    f32 obs is cast to bf16 in-kernel; MXU runs bf16 operands with f32
    accumulation; bias-add / ReLU happen in f32 on the VPU; activations are
    re-cast to bf16 between layers.  Output tile is 128-lane dense f32.
    """
    x = x_ref[...].astype(jnp.bfloat16)               # (TB, D_in) bf16

    h1 = jnp.dot(x, w1_ref[...], preferred_element_type=jnp.float32)
    h1 = jnp.maximum(h1 + b1_ref[...], 0.0).astype(jnp.bfloat16)

    h2 = jnp.dot(h1, w2_ref[...], preferred_element_type=jnp.float32)
    h2 = jnp.maximum(h2 + b2_ref[...], 0.0).astype(jnp.bfloat16)

    out_ref[...] = (
        jnp.dot(h2, wh_ref[...], preferred_element_type=jnp.float32)
        + bh_ref[...]
    )


def prepare_inference_params(params):
    """One-time weight prep (hoisted out of the forward hot path).

    - Weights cast to bf16 (MXU-native operands); biases stay f32.
    - pi/v heads fused into one weight [W_pi | W_v] and zero-padded to a
      128-lane-dense head so the kernel's output store is unmasked.
    Returns (prepared_dict, n_actions).
    """
    n_actions = params["w_pi"].shape[1]
    n_head = n_actions + 1
    n_head_pad = 128 * pl.cdiv(n_head, 128)           # lane-dense head width

    w_head = jnp.concatenate([params["w_pi"], params["w_v"]], axis=1)
    b_head = jnp.concatenate([params["b_pi"], params["b_v"]], axis=1)
    pad = n_head_pad - n_head
    w_head = jnp.pad(w_head, ((0, 0), (0, pad)))
    b_head = jnp.pad(b_head, ((0, 0), (0, pad)))

    prepared = {
        "w1": params["w1"].astype(jnp.bfloat16),
        "b1": params["b1"].astype(jnp.float32),
        "w2": params["w2"].astype(jnp.bfloat16),
        "b2": params["b2"].astype(jnp.float32),
        "w_head": w_head.astype(jnp.bfloat16),
        "b_head": b_head.astype(jnp.float32),
    }
    return prepared, n_actions


def _default_block_b(batch):
    """Batch tile: single tile for small B; >=2 grid steps (v7x megacore) and
    up to 1024-row tiles (amortize per-step overhead) for larger B."""
    if batch <= 256:
        return batch
    half = 8 * pl.cdiv(pl.cdiv(batch, 2), 8)           # 8-sublane multiple
    return min(1024, half)


def actor_critic_forward(obs, prepared, n_actions, *, block_b=None):
    """obs: (B, D_in) float32.  prepared: output of prepare_inference_params.

    Returns (pi, v) in float32, matching the PyTorch forward (up to bf16
    operand rounding on the MXU).
    """
    B, d_in = obs.shape
    fc1 = prepared["w1"].shape[1]
    fc2 = prepared["w2"].shape[1]
    n_head_pad = prepared["w_head"].shape[1]

    if block_b is None:
        block_b = _default_block_b(B)
    grid = (pl.cdiv(B, block_b),)

    batch_map = lambda i: (i, 0)   # tiled over batch
    const_map = lambda i: (0, 0)   # weights/biases: same block -> VMEM-resident

    flops = 2 * B * (d_in * fc1 + fc1 * fc2 + fc2 * n_head_pad)
    bytes_accessed = (
        B * d_in * 4                                   # obs (f32)
        + (d_in * fc1 + fc1 * fc2 + fc2 * n_head_pad) * 2   # bf16 weights
        + (fc1 + fc2 + n_head_pad) * 4                 # f32 biases
        + B * n_head_pad * 4                           # f32 output
    )

    out = pl.pallas_call(
        _actor_critic_kernel,
        out_shape=jax.ShapeDtypeStruct((B, n_head_pad), jnp.float32),
        grid=grid,
        in_specs=[
            pl.BlockSpec((block_b, d_in), batch_map),        # obs tile (f32)
            pl.BlockSpec((d_in, fc1), const_map),            # W1 (bf16)
            pl.BlockSpec((1, fc1), const_map),               # b1 (f32)
            pl.BlockSpec((fc1, fc2), const_map),             # W2 (bf16)
            pl.BlockSpec((1, fc2), const_map),               # b2 (f32)
            pl.BlockSpec((fc2, n_head_pad), const_map),      # [W_pi|W_v|0] (bf16)
            pl.BlockSpec((1, n_head_pad), const_map),        # [b_pi|b_v|0] (f32)
        ],
        out_specs=pl.BlockSpec((block_b, n_head_pad), batch_map),
        compiler_params=pltpu.CompilerParams(
            dimension_semantics=("parallel",),   # v7x megacore: split batch
        ),
        cost_estimate=pl.CostEstimate(
            flops=flops, transcendentals=0, bytes_accessed=bytes_accessed),
    )(obs.astype(jnp.float32), prepared["w1"], prepared["b1"],
      prepared["w2"], prepared["b2"], prepared["w_head"], prepared["b_head"])

    pi = out[:, :n_actions]
    v = out[:, n_actions:n_actions + 1]
    return pi, v


def init_params(key, input_dims, fc1_dims, fc2_dims, n_actions):
    """Deterministic init matching nn.Linear's U(-1/sqrt(fan_in), 1/sqrt(fan_in)).

    Weights are stored as (in, out) — transposed relative to PyTorch's (out, in).
    Master params stay f32; prepare_inference_params casts/fuses them once.
    """
    def linear(k, fan_in, fan_out):
        kw, kb = jax.random.split(k)
        bound = 1.0 / jnp.sqrt(jnp.asarray(fan_in, jnp.float32))
        w = jax.random.uniform(kw, (fan_in, fan_out), jnp.float32, -bound, bound)
        b = jax.random.uniform(kb, (1, fan_out), jnp.float32, -bound, bound)
        return w, b

    k1, k2, k3, k4 = jax.random.split(key, 4)
    w1, b1 = linear(k1, input_dims, fc1_dims)
    w2, b2 = linear(k2, fc1_dims, fc2_dims)
    w_pi, b_pi = linear(k3, fc2_dims, n_actions)
    w_v, b_v = linear(k4, fc2_dims, 1)
    return {
        "w1": w1, "b1": b1,
        "w2": w2, "b2": b2,
        "w_pi": w_pi, "b_pi": b_pi,
        "w_v": w_v, "b_v": b_v,
    }


# TODO(synk): optim.Adam / .to(device) from the PyTorch module are training &
# host-side plumbing, not part of the forward pass, and are not translated.


if __name__ == "__main__":
    # Small shapes consistent with ActorCriticNetwork(lr, [input_dims], fc1, fc2, n_actions).
    # NOTE: fc1/fc2 multiples of 128 would fill the MXU better; 64 matches the
    # typical RL config and is kept for fidelity.
    batch = 8
    input_dims = 32
    fc1_dims = 64
    fc2_dims = 64
    n_actions = 4

    key = jax.random.PRNGKey(0)
    k_obs, k_params = jax.random.split(key)

    obs = jax.random.normal(k_obs, (batch, input_dims), jnp.float32)
    params = init_params(k_params, input_dims, fc1_dims, fc2_dims, n_actions)
    prepared, na = prepare_inference_params(params)

    pi, v = actor_critic_forward(obs, prepared, na)
    jax.block_until_ready((pi, v))
    assert pi.shape == (batch, n_actions) and v.shape == (batch, 1)

    # Reference 1: exact emulation of the kernel's bf16-operand / f32-accumulate
    # math in plain JAX (tight tolerance).
    def bf(x):
        return x.astype(jnp.bfloat16).astype(jnp.float32)

    h1 = jnp.maximum(bf(obs) @ bf(params["w1"]) + params["b1"], 0.0)
    h2 = jnp.maximum(bf(h1) @ bf(params["w2"]) + params["b2"], 0.0)
    pi_bf = bf(h2) @ bf(params["w_pi"]) + params["b_pi"]
    v_bf = bf(h2) @ bf(params["w_v"]) + params["b_v"]
    assert jnp.allclose(pi, pi_bf, atol=1e-3, rtol=1e-3)
    assert jnp.allclose(v, v_bf, atol=1e-3, rtol=1e-3)

    # Reference 2: full-f32 PyTorch-equivalent forward (loose tolerance — the
    # only difference is bf16 operand rounding on the MXU).
    h1f = jnp.maximum(obs @ params["w1"] + params["b1"], 0.0)
    h2f = jnp.maximum(h1f @ params["w2"] + params["b2"], 0.0)
    pi_ref = h2f @ params["w_pi"] + params["b_pi"]
    v_ref = h2f @ params["w_v"] + params["b_v"]
    assert jnp.allclose(pi, pi_ref, atol=5e-2, rtol=5e-2)
    assert jnp.allclose(v, v_ref, atol=5e-2, rtol=5e-2)

    # Multi-step grid path (partial last tile) to exercise batch tiling.
    B2 = 300
    obs2 = jax.random.normal(jax.random.PRNGKey(1), (B2, input_dims), jnp.float32)
    pi2, v2 = actor_critic_forward(obs2, prepared, na)
    jax.block_until_ready((pi2, v2))
    h1b = jnp.maximum(bf(obs2) @ bf(params["w1"]) + params["b1"], 0.0)
    h2b = jnp.maximum(bf(h1b) @ bf(params["w2"]) + params["b2"], 0.0)
    assert jnp.allclose(pi2, bf(h2b) @ bf(params["w_pi"]) + params["b_pi"],
                        atol=1e-3, rtol=1e-3)
    assert jnp.allclose(v2, bf(h2b) @ bf(params["w_v"]) + params["b_v"],
                        atol=1e-3, rtol=1e-3)

    print("KERNEL_OK")
</pallas_src>

<mosaic_0001>
module attributes {stable_mosaic.version = 11 : i64} {
  func.func @_actor_critic_kernel(%arg0: i32, %arg1: memref<8x32xf32, #tpu.memory_space<vmem>>, %arg2: memref<32x64xbf16, #tpu.memory_space<vmem>>, %arg3: memref<1x64xf32, #tpu.memory_space<vmem>>, %arg4: memref<64x64xbf16, #tpu.memory_space<vmem>>, %arg5: memref<1x64xf32, #tpu.memory_space<vmem>>, %arg6: memref<64x128xbf16, #tpu.memory_space<vmem>>, %arg7: memref<1x128xf32, #tpu.memory_space<vmem>>, %arg8: memref<8x128xf32, #tpu.memory_space<vmem>>) attributes {dimension_semantics = [#tpu.dimension_semantics<parallel>], iteration_bounds = array<i64: 1>, scalar_prefetch = 0 : i64, scratch_operands = 0 : i64, tpu.core_type = #tpu.core_type<tc>, window_params = [{transform_indices = @transform_0, window_bounds = array<i64: 8, 32>}, {pipeline_mode = #tpu.pipeline_mode<synchronous>, transform_indices = @transform_1, window_bounds = array<i64: 32, 64>}, {pipeline_mode = #tpu.pipeline_mode<synchronous>, transform_indices = @transform_2, window_bounds = array<i64: 1, 64>}, {pipeline_mode = #tpu.pipeline_mode<synchronous>, transform_indices = @transform_3, window_bounds = array<i64: 64, 64>}, {pipeline_mode = #tpu.pipeline_mode<synchronous>, transform_indices = @transform_4, window_bounds = array<i64: 1, 64>}, {pipeline_mode = #tpu.pipeline_mode<synchronous>, transform_indices = @transform_5, window_bounds = array<i64: 64, 128>}, {pipeline_mode = #tpu.pipeline_mode<synchronous>, transform_indices = @transform_6, window_bounds = array<i64: 1, 128>}, {transform_indices = @transform_7, window_bounds = array<i64: 8, 128>}]} {
    %c0 = arith.constant 0 : index
    %c0_0 = arith.constant 0 : index
    %0 = vector.load %arg1[%c0, %c0_0] : memref<8x32xf32, #tpu.memory_space<vmem>>, vector<8x32xf32>
    %1 = arith.truncf %0 : vector<8x32xf32> to vector<8x32xbf16>
    %c0_1 = arith.constant 0 : index
    %c0_2 = arith.constant 0 : index
    %2 = vector.load %arg2[%c0_1, %c0_2] : memref<32x64xbf16, #tpu.memory_space<vmem>>, vector<32x64xbf16>
    %cst = arith.constant dense<0.000000e+00> : vector<8x64xf32>
    %3 = tpu.matmul %1, %2, %cst {dimension_numbers = #tpu.dot_dimension_numbers<[1], [0], [0], [1], [0, 0, 1, 1], [], []>} : vector<8x32xbf16>, vector<32x64xbf16>, vector<8x64xf32> -> vector<8x64xf32>
    %c0_3 = arith.constant 0 : index
    %c0_4 = arith.constant 0 : index
    %4 = vector.load %arg3[%c0_3, %c0_4] : memref<1x64xf32, #tpu.memory_space<vmem>>, vector<1x64xf32>
    %5 = vector.broadcast %4 : vector<1x64xf32> to vector<8x64xf32>
    %6 = arith.addf %3, %5 : vector<8x64xf32>
    %cst_5 = arith.constant 0.000000e+00 : f32
    %7 = vector.broadcast %cst_5 : f32 to vector<8x64xf32>
    %8 = arith.maximumf %6, %7 : vector<8x64xf32>
    %9 = arith.truncf %8 : vector<8x64xf32> to vector<8x64xbf16>
    %c0_6 = arith.constant 0 : index
    %c0_7 = arith.constant 0 : index
    %10 = vector.load %arg4[%c0_6, %c0_7] : memref<64x64xbf16, #tpu.memory_space<vmem>>, vector<64x64xbf16>
    %cst_8 = arith.constant dense<0.000000e+00> : vector<8x64xf32>
    %11 = tpu.matmul %9, %10, %cst_8 {dimension_numbers = #tpu.dot_dimension_numbers<[1], [0], [0], [1], [0, 0, 1, 1], [], []>} : vector<8x64xbf16>, vector<64x64xbf16>, vector<8x64xf32> -> vector<8x64xf32>
    %c0_9 = arith.constant 0 : index
    %c0_10 = arith.constant 0 : index
    %12 = vector.load %arg5[%c0_9, %c0_10] : memref<1x64xf32, #tpu.memory_space<vmem>>, vector<1x64xf32>
    %13 = vector.broadcast %12 : vector<1x64xf32> to vector<8x64xf32>
    %14 = arith.addf %11, %13 : vector<8x64xf32>
    %cst_11 = arith.constant 0.000000e+00 : f32
    %15 = vector.broadcast %cst_11 : f32 to vector<8x64xf32>
    %16 = arith.maximumf %14, %15 : vector<8x64xf32>
    %17 = arith.truncf %16 : vector<8x64xf32> to vector<8x64xbf16>
    %c0_12 = arith.constant 0 : index
    %c0_13 = arith.constant 0 : index
    %18 = vector.load %arg6[%c0_12, %c0_13] : memref<64x128xbf16, #tpu.memory_space<vmem>>, vector<64x128xbf16>
    %cst_14 = arith.constant dense<0.000000e+00> : vector<8x128xf32>
    %19 = tpu.matmul %17, %18, %cst_14 {dimension_numbers = #tpu.dot_dimension_numbers<[1], [0], [0], [1], [0, 0, 1, 1], [], []>} : vector<8x64xbf16>, vector<64x128xbf16>, vector<8x128xf32> -> vector<8x128xf32>
    %c0_15 = arith.constant 0 : index
    %c0_16 = arith.constant 0 : index
    %20 = vector.load %arg7[%c0_15, %c0_16] : memref<1x128xf32, #tpu.memory_space<vmem>>, vector<1x128xf32>
    %21 = vector.broadcast %20 : vector<1x128xf32> to vector<8x128xf32>
    %22 = arith.addf %19, %21 : vector<8x128xf32>
    %c0_17 = arith.constant 0 : index
    %c0_18 = arith.constant 0 : index
    %23 = vector.load %arg8[%c0_17, %c0_18] : memref<8x128xf32, #tpu.memory_space<vmem>>, vector<8x128xf32>
    tpu.vector_store %arg8[%c0_17, %c0_18], %22 {strides = array<i32>} : memref<8x128xf32, #tpu.memory_space<vmem>>, vector<8x128xf32>,
    return
  }
  func.func @transform_0(%arg0: i32) -> (i32, i32) {
    %c0_i32 = arith.constant 0 : i32
    %c0_i32_0 = arith.constant 0 : i32
    return %arg0, %c0_i32 : i32, i32
  }
  func.func @transform_1(%arg0: i32) -> (i32, i32) {
    %c0_i32 = arith.constant 0 : i32
    %c0_i32_0 = arith.constant 0 : i32
    %c0_i32_1 = arith.constant 0 : i32
    return %c0_i32, %c0_i32_0 : i32, i32
  }
  func.func @transform_2(%arg0: i32) -> (i32, i32) {
    %c0_i32 = arith.constant 0 : i32
    %c0_i32_0 = arith.constant 0 : i32
    %c0_i32_1 = arith.constant 0 : i32
    return %c0_i32, %c0_i32_0 : i32, i32
  }
  func.func @transform_3(%arg0: i32) -> (i32, i32) {
    %c0_i32 = arith.constant 0 : i32
    %c0_i32_0 = arith.constant 0 : i32
    %c0_i32_1 = arith.constant 0 : i32
    return %c0_i32, %c0_i32_0 : i32, i32
  }
  func.func @transform_4(%arg0: i32) -> (i32, i32) {
    %c0_i32 = arith.constant 0 : i32
    %c0_i32_0 = arith.constant 0 : i32
    %c0_i32_1 = arith.constant 0 : i32
    return %c0_i32, %c0_i32_0 : i32, i32
  }
  func.func @transform_5(%arg0: i32) -> (i32, i32) {
    %c0_i32 = arith.constant 0 : i32
    %c0_i32_0 = arith.constant 0 : i32
    %c0_i32_1 = arith.constant 0 : i32
    return %c0_i32, %c0_i32_0 : i32, i32
  }
  func.func @transform_6(%arg0: i32) -> (i32, i32) {
    %c0_i32 = arith.constant 0 : i32
    %c0_i32_0 = arith.constant 0 : i32
    %c0_i32_1 = arith.constant 0 : i32
    return %c0_i32, %c0_i32_0 : i32, i32
  }
  func.func @transform_7(%arg0: i32) -> (i32, i32) {
    %c0_i32 = arith.constant 0 : i32
    %c0_i32_0 = arith.constant 0 : i32
    return %arg0, %c0_i32 : i32, i32
  }
}

</mosaic_0001>

<bundles_post_ra>
// kernel: tpu_custom_call.1
= control target key start
LH: loop header
LB: loop body
LE: loop exit
PB: predicated region body
PF: predicated region fallthrough
CT: control target
= control target key end

     0   :  { %12 = vsyncpa [#allocation3], 0  ;;  %s612_s0 = inlined_call_operand.hbm [shape: f32[8,32], index: 0, kind: input, shape index: {}]   ;;  %s613_s1 = inlined_call_operand.hbm [shape: bf16[32,64], index: 1, kind: input, shape index: {}]   ;;  %s614_s2 = inlined_call_operand.vmem [shape: f32[1,64], index: 2, kind: input, shape index: {}]   ;;  %s615_s3 = inlined_call_operand.hbm [shape: bf16[64,64], index: 3, kind: input, shape index: {}]   ;;  %s616_s4 = inlined_call_operand.vmem [shape: f32[1,64], index: 4, kind: input, shape index: {}]   ;;  %s617_s5 = inlined_call_operand.hbm [shape: bf16[64,128], index: 5, kind: input, shape index: {}]   ;;  %s618_s6 = inlined_call_operand.vmem [shape: f32[1,128], index: 6, kind: input, shape index: {}]   ;;  %s619_s7 = inlined_call_operand.hbm [shape: f32[8,128], index: 7, kind: output, shape index: {}]  }
   0x1   :  { %13 = vsyncpa [#allocation6], 0 }
   0x2   :  { %14 = vsyncpa [#allocation9], 0 }
   0x3   :  { %15 = vsyncpa [#allocation4], 0  ;;  %s525_s24 = smov [#allocation5]  }
   0x4   :  { %s31_s25 = sshll.u32 %s525_s24, 4  ;;  %s32_s25 = int_to_ptr.vmem [resolvable:$true] %s31_s25 }
   0x5   :  { %s425_s26 = scalar_lea.vmem %s32_s25, 256  ;;  %p430_p1 = scmp.lt.s32.totalorder %s32_s25, %s32_s25 }
   0x6   :  { %p426_p0 = scmp.ne.s32.totalorder %s32_s25, %s425_s26  ;;  %p431_p2 = scmp.lt.s32.totalorder %s425_s26, %s425_s26 }
   0x8   :  { %p432_p3 = por %p431_p2, %p430_p1 }
   0xa   :  { %p433_p4 = pnand %p432_p3, %p426_p0 }
   0xc   :  { %436 = shalt.err (!%p433_p4)
}
   0xd   :  { %s526_s27 = smov 64   ;;  %s527_s28 = smov 4  }
   0xe   :  { %37 = dma.hbm_to_vmem [thread:$0]  %s613_s1, 256, %s32_s25, [#allocation6], %s526_s27, %s526_s27, %s527_s28  }
   0xf   :  { %s528_s8 = smov [#allocation2]   ;;  %s529_s10 = smov [#allocation7]  }
  0x10   :  { %s22_s9 = sshll.u32 %s528_s8, 4  ;;  %s45_s11 = sshll.u32 %s529_s10, 4  ;;  %s23_s9 = int_to_ptr.vmem [resolvable:$true] %s22_s9  ;;  %s46_s11 = int_to_ptr.vmem [resolvable:$true] %s45_s11 }
  0x11   :  { %s445_s12 = scalar_lea.vmem %s23_s9, 128  ;;  %p450_p6 = scmp.lt.s32.totalorder %s23_s9, %s23_s9 }
  0x12   :  { %p446_p5 = scmp.ne.s32.totalorder %s23_s9, %s445_s12  ;;  %p451_p7 = scmp.lt.s32.totalorder %s445_s12, %s445_s12 }
  0x14   :  { %p452_p8 = por %p451_p7, %p450_p6 }
  0x16   :  { %p453_p9 = pnand %p452_p8, %p446_p5 }
  0x18   :  { %456 = shalt.err (!%p453_p9)
}
  0x19   :  { %25 = dma.hbm_to_vmem [thread:$0]  %s612_s0, 128, %s23_s9, [#allocation3]  }
  0x1a   :  { %s465_s15 = scalar_lea.vmem %s46_s11, 512  ;;  %p470_p11 = scmp.lt.s32.totalorder %s46_s11, %s46_s11 }
  0x1b   :  { %p466_p10 = scmp.ne.s32.totalorder %s46_s11, %s465_s15  ;;  %p471_p12 = scmp.lt.s32.totalorder %s465_s15, %s465_s15 }
  0x1d   :  { %p472_p13 = por %p471_p12, %p470_p11 }
  0x1f   :  { %p473_p0 = pnand %p472_p13, %p466_p10 }
  0x21   :  { %476 = shalt.err (!%p473_p0)
}
  0x22   :  { %51 = dma.hbm_to_vmem [thread:$0]  %s615_s3, 512, %s46_s11, [#allocation6], %s526_s27, %s526_s27, %s527_s28  }
  0x23   :  { %s530_s17 = smov [#allocation8]  }
  0x24   :  { %s59_s18 = sshll.u32 %s530_s17, 4  ;;  %s60_s18 = int_to_ptr.vmem [resolvable:$true] %s59_s18 }
  0x25   :  { %s485_s19 = scalar_lea.vmem %s60_s18, 512  ;;  %p490_p2 = scmp.lt.s32.totalorder %s60_s18, %s60_s18 }
  0x26   :  { %p486_p1 = scmp.ne.s32.totalorder %s60_s18, %s485_s19  ;;  %p491_p3 = scmp.lt.s32.totalorder %s485_s19, %s485_s19 }
  0x28   :  { %p492_p4 = por %p491_p3, %p490_p2 }
  0x2a   :  { %p493_p5 = pnand %p492_p4, %p486_p1 }
  0x2c   :  { %496 = shalt.err (!%p493_p5)
}
  0x2d   :  { %65 = dma.hbm_to_vmem [thread:$0]  %s617_s5, 512, %s60_s18, [#allocation9], %s526_s27, %s526_s27, %s527_s28  }
  0x2e   :  { %517 = dma.done.wait [#allocation3], 128  }
  0x2f   :  { %518 = vsyncadd [#allocation3], 4294967168 }
  0x30   :  { %519 = dma.done.wait [#allocation6], 768  }
  0x31   :  { %520 = vsyncadd [#allocation6], 4294966528 }
  0x32   :  { %521 = dma.done.wait [#allocation9], 512  }
  0x33   :  { %522 = vsyncadd [#allocation9], 4294966784  ;;  %v531_v0 = vmov 0.0   ;;  %vm532_vm0 = vmmov 0   ;;  %v407_v1 = vld [vmem:[#allocation5 + $0x8] sm:$0xff]   ;;  %v408_v2 = vld [vmem:[#allocation5] sm:$0xff]  }
  0x34   :  { %366 = vmatprep.subr.bf16.mxu0 %v531_v0  ;;  %370 = vmatprep.mubr.msk.bf16.mxu0 %vm532_vm0, %v531_v0  ;;  %v81_v3 = vld [vmem:[#allocation2] sm:$0xff]  ;;  %v409_v4 = vld [vmem:[#allocation7 + $0x18] sm:$0xff]   ;;  %vm106_vm1 = vcmask 261120   ;;  %v410_v5 = vld [vmem:[#allocation7 + $0x10] sm:$0xff]   ;;  %vm191_vm2 = vcmask 523264   ;;  %s533_s24 = smov [#allocation10]  }
  0x35   :  { %374 = vmatprep.subr.bf16.mxu1 %v531_v0  ;;  %382 = vmatprep.mubr.msk.bf16.mxu1 %vm532_vm0, %v531_v0  ;;  %v82_v6 = vpack.c.bf16 %v81_v3, %v81_v3  ;;  %v411_v7 = vld [vmem:[#allocation7 + $0x8] sm:$0xff]   ;;  %v412_v8 = vld [vmem:[#allocation7] sm:$0xff]   ;;  %v413_v9 = vld [vmem:[#allocation8 + $0x18] sm:$0xff]   ;;  %s326_s25 = sshll.u32 %s533_s24, 4  ;;  %s327_s25 = int_to_ptr.vmem [resolvable:$true] %s326_s25 }
  0x36   :  { %367 = vmatpush3.bf16.msra.mxu0 %v407_v1  ;;  %375 = vmatpush3.bf16.msra.mxu1 %v409_v4  ;;  %v414_v10 = vld [vmem:[#allocation8 + $0x10] sm:$0xff]   ;;  %v337_v11 = vld [vmem:[%s614_s2] ss:$0 sm:$0xff]  ;;  %v416_v20 = vld [vmem:[#allocation8] sm:$0xff]   ;;  %p502_p7 = scmp.lt.s32.totalorder %s327_s25, %s327_s25 }
  0x37   :  { %368 = vmatprep.subr.bf16.mxu0 %v531_v0  ;;  %376 = vmatprep.subr.bf16.mxu1 %v531_v0  ;;  %v415_v19 = vld [vmem:[#allocation8 + $0x8] sm:$0xff]  }
  0x38   :  { %v341_v21 = vld [vmem:[%s616_s4] ss:$0 sm:$0xff]  ;;  %s497_s4 = scalar_lea.vmem %s327_s25, 128 }
  0x39   :  { %v347_v29 = vld [vmem:[%s618_s6] ss:$0 sm:$0xff]  ;;  %p498_p6 = scmp.ne.s32.totalorder %s327_s25, %s497_s4  ;;  %p503_p8 = scmp.lt.s32.totalorder %s497_s4, %s497_s4 }
  0x3a   :  { %369 = vmatpush3.bf16.msra.mxu0 %v408_v2  ;;  %377 = vmatpush3.bf16.msra.mxu1 %v410_v5 }
  0x3b   :  { %386 = vmatprep.subr.bf16.mxu0 %v531_v0  ;;  %378 = vmatprep.subr.bf16.mxu1 %v531_v0  ;;  %p504_p9 = por %p503_p8, %p502_p7 }
  0x3d   :  { %371 = vmatmul.mubr.msk.bf16.vlgmr.msra.gmra.mxu0 %vm106_vm1, %v82_v6  ;;  %p505_p10 = pnand %p504_p9, %p498_p6 }
  0x3e   :  { %394 = vmatprep.mubr.msk.bf16.mxu0 %vm532_vm0, %v531_v0  ;;  %379 = vmatpush3.bf16.msra.mxu1 %v411_v7 }
  0x3f   :  { %380 = vmatprep.subr.bf16.mxu1 %v531_v0  ;;  %387 = vmatpush3.bf16.msra.mxu0 %v413_v9 }
  0x40   :  { %388 = vmatprep.subr.bf16.mxu0 %v531_v0 }
  0x42   :  { %381 = vmatpush3.bf16.msra.mxu1 %v412_v8 }
  0x43   :  { %389 = vmatpush3.bf16.msra.mxu0 %v414_v10 }
  0x44   :  { %390 = vmatprep.subr.bf16.mxu0 %v531_v0 }
  0x47   :  { %391 = vmatpush3.bf16.msra.mxu0 %v415_v19 }
  0x48   :  { %392 = vmatprep.subr.bf16.mxu0 %v531_v0 }
  0x4b   :  { %393 = vmatpush3.bf16.msra.mxu0 %v416_v20 }
  0xfd   :  { %v144_v12 = vpop.f32.mrf.mxu0 }
  0xfe   :  { %v145_v13 = vadd.f32 %v337_v11, %v144_v12 }
  0xff   :  { %v372_v14 = vpop.f32.mrf.mxu0 }
 0x100   :  { %v150_v15 = vmax.f32 %v145_v13, 0.0 }
 0x101   :  { %v147_v16 = vpop.f32.mrf.mxu0 }
 0x102   :  { %v151_v17 = vpack.c.bf16 %v150_v15, %v150_v15 }
 0x103   :  { %v373_v18 = vpop.f32.mrf.mxu0 }
 0x104   :  { %383 = vmatmul.mubr.msk.bf16.vlgmr.msra.gmra.mxu1 %vm191_vm2, %v151_v17 }
 0x1c4   :  { %v229_v22 = vpop.f32.mrf.mxu1 }
 0x1c5   :  { %v230_v23 = vadd.f32 %v341_v21, %v229_v22 }
 0x1c6   :  { %v384_v24 = vpop.f32.mrf.mxu1 }
 0x1c7   :  { %v235_v25 = vmax.f32 %v230_v23, 0.0 }
 0x1c8   :  { %v232_v26 = vpop.f32.mrf.mxu1 }
 0x1c9   :  { %v236_v27 = vpack.c.bf16 %v235_v25, %v235_v25 }
 0x1ca   :  { %v385_v28 = vpop.f32.mrf.mxu1 }
 0x1cb   :  { %395 = vmatmul.mubr.msk.bf16.vlgmr.msra.gmra.mxu0 %vm191_vm2, %v236_v27 }
 0x28b   :  { %v313_v30 = vpop.f32.mrf.mxu0 }
 0x28c   :  { %v314_v31 = vadd.f32 %v347_v29, %v313_v30 }
 0x28d   :  { %v396_v32 = vpop.f32.mrf.mxu0 }
 0x28e   :  { %319 = vst [vmem:[#allocation10] sm:$0xff] %v314_v31 }
 0x28f   :  { %v316_v33 = vpop.f32.mrf.mxu0 }
 0x290   :  { %508 = shalt.err (!%p505_p10)
}
 0x291   :  { %329 = dma.vmem_to_hbm [thread:$0]  %s327_s25, 128, %s619_s7, [#allocation4]   ;;  %v397_v34 = vpop.f32.mrf.mxu0 }
 0x292   :  { %523 = dma.done.wait [#allocation4], 128  }
 0x293   :  { %524 = vsyncadd [#allocation4], 4294967168 }
 0x294   :  { %333 = vsyncpa [#allocation3], 1 }
 0x295   :  { %334 = vsyncpa [#allocation6], 1 }
 0x296   :  { %335 = vsyncpa [#allocation9], 1 }
 0x297   :  { %336 = vsyncpa [#allocation4], 1 }

</bundles_post_ra>
